<compile_context>
chip_gen: v7x
topology: tpu7x:2x2x1
jax: 0.10.0
libtpu: 0.0.40
codegen_flags: <defaults>
</compile_context>

<pallas_src>
import functools

import jax
import jax.numpy as jnp
from jax.experimental import pallas as pl
from jax.experimental.pallas import tpu as pltpu

LOG_SIG_MAX = 2.0
LOG_SIG_MIN = -20.0


def _round_up(x, m):
    return ((x + m - 1) // m) * m


# ----------------------------------------------------------------------------
# Kernel: one batch tile per grid step.
#   h   = relu(state @ W1 + b1)
#   h   = relu(h     @ W2 + b2)
#   out = h @ W_head + b_head        # [TILE_B, OUT_W]; cols [0,A) mean,
#                                    # [A,2A) log_std, [2A,OUT_W) zero padding
#   out[:, A:] = clamp(out[:, A:], LOG_SIG_MIN, LOG_SIG_MAX)   (pad lanes stay 0)
# Weights arrive in the compute dtype (f32 or bf16); accumulation and all
# elementwise math (relu, clamp) are f32.
# ----------------------------------------------------------------------------
def gaussian_policy_kernel(
    state_ref,            # [TILE_B, IN_W]   compute dtype
    w1_ref, b1_ref,       # [IN_W, H] compute, [1, H] f32
    w2_ref, b2_ref,       # [H, H]   compute, [1, H] f32
    wh_ref, bh_ref,       # [H, OUT_W] compute, [1, OUT_W] f32 (mean|log_std|0-pad)
    out_ref,              # [TILE_B, OUT_W] f32
    *, num_actions,
):
    cdt = w1_ref.dtype

    x = state_ref[...]
    h = jnp.dot(x, w1_ref[...], preferred_element_type=jnp.float32) + b1_ref[...]
    h = jnp.maximum(h, 0.0).astype(cdt)
    h = jnp.dot(h, w2_ref[...], preferred_element_type=jnp.float32) + b2_ref[...]
    h = jnp.maximum(h, 0.0).astype(cdt)

    out = jnp.dot(h, wh_ref[...], preferred_element_type=jnp.float32) + bh_ref[...]

    # Clamp only the log_std (and zero-pad) lanes; lane-masked select keeps a
    # single dense, unmasked store of the full [TILE_B, OUT_W] tile.
    col = jax.lax.broadcasted_iota(jnp.int32, out.shape, dimension=1)
    clamped = jnp.clip(out, LOG_SIG_MIN, LOG_SIG_MAX)
    out = jnp.where(col >= num_actions, clamped, out)

    out_ref[...] = out.astype(out_ref.dtype)


# ----------------------------------------------------------------------------
# Tile-size selection: multiples of `align`, minimize batch padding, prefer the
# largest tile on ties (amortizes per-step overhead), and keep >= 2 grid steps
# whenever the batch allows (v7x megacore; no-op on single-TC v5e/v6e).
# ----------------------------------------------------------------------------
def _choose_tile_b(B, max_tile, align):
    b_al = _round_up(max(B, 1), align)
    if b_al <= align:
        return align
    cap = max(align, min(max_tile, _round_up(pl.cdiv(b_al, 2), align)))
    best_t, best_pad = align, _round_up(B, align) - B
    for t in range(align, cap + 1, align):
        pad = _round_up(B, t) - B
        if pad <= best_pad:
            best_t, best_pad = t, pad
    return best_t


# ----------------------------------------------------------------------------
# Wrapper: batch-tiled pallas_call; weights resident (single-buffered) across
# the grid, state/output tiles streamed with double buffering.
# ----------------------------------------------------------------------------
def gaussian_policy_forward(state, params, num_actions, *, tile_b=512,
                            compute_dtype=jnp.float32):
    B, num_inputs = state.shape
    IN_W, H = params["w1"].shape          # IN_W = round_up(num_inputs, 128)
    OUT_W = params["w_head"].shape[1]     # OUT_W = round_up(2*A, 128)
    A = num_actions
    assert num_inputs <= IN_W and 2 * A <= OUT_W

    align = 16 if compute_dtype == jnp.bfloat16 else 8
    TILE_B = _choose_tile_b(B, tile_b, align)
    B_pad = _round_up(B, TILE_B)

    # Zero-pad batch rows and state features (padded K lanes hit zero W1 rows).
    state = jnp.pad(state, ((0, B_pad - B), (0, IN_W - num_inputs)))
    state = state.astype(compute_dtype)

    # Weights in compute dtype (bf16 on v6e/v7x), biases stay f32 (added post-acc).
    w1 = params["w1"].astype(compute_dtype)
    w2 = params["w2"].astype(compute_dtype)
    wh = params["w_head"].astype(compute_dtype)
    b1, b2, bh = params["b1"], params["b2"], params["b_head"]

    bpe = jnp.dtype(compute_dtype).itemsize
    weight_elems = IN_W * H + H * H + H * OUT_W
    flops = 2 * B_pad * weight_elems
    bytes_accessed = (B_pad * IN_W * bpe              # state
                      + weight_elems * bpe            # weights
                      + (2 * H + OUT_W) * 4           # biases
                      + B_pad * OUT_W * 4)            # output
    cost = pl.CostEstimate(flops=int(flops), transcendentals=0,
                           bytes_accessed=int(bytes_accessed))

    # Single-buffered resident weights + double-buffered streamed tiles + slack.
    est_vmem = (weight_elems * bpe + (2 * H + OUT_W) * 4
                + 2 * TILE_B * (IN_W * bpe + OUT_W * 4)
                + 4 * TILE_B * H * 4          # activation intermediates
                + (2 << 20))
    vmem_limit = (int(min(est_vmem * 3 // 2, 96 * 1024 * 1024))
                  if est_vmem > (16 << 20) else None)

    kernel = functools.partial(gaussian_policy_kernel, num_actions=A)
    resident = pl.Buffered(1)   # block index never changes -> no 2nd buffer

    out = pl.pallas_call(
        kernel,
        out_shape=jax.ShapeDtypeStruct((B_pad, OUT_W), jnp.float32),
        grid=(B_pad // TILE_B,),
        in_specs=[
            pl.BlockSpec((TILE_B, IN_W), lambda i: (i, 0)),                      # state tile
            pl.BlockSpec((IN_W, H), lambda i: (0, 0), pipeline_mode=resident),   # w1
            pl.BlockSpec((1, H), lambda i: (0, 0), pipeline_mode=resident),      # b1
            pl.BlockSpec((H, H), lambda i: (0, 0), pipeline_mode=resident),      # w2
            pl.BlockSpec((1, H), lambda i: (0, 0), pipeline_mode=resident),      # b2
            pl.BlockSpec((H, OUT_W), lambda i: (0, 0), pipeline_mode=resident),  # packed head W
            pl.BlockSpec((1, OUT_W), lambda i: (0, 0), pipeline_mode=resident),  # packed head b
        ],
        out_specs=pl.BlockSpec((TILE_B, OUT_W), lambda i: (i, 0)),
        compiler_params=pltpu.CompilerParams(
            dimension_semantics=("parallel",),
            vmem_limit_bytes=vmem_limit,
        ),
        cost_estimate=cost,
    )(state, w1, b1, w2, b2, wh, bh)

    mean = out[:B, :A]
    log_std = out[:B, A:2 * A]   # never expose zero-padded lanes
    return mean, log_std


# ----------------------------------------------------------------------------
# Deterministic init matching PyTorch (xavier_uniform_ gain=1, bias=0).
# Weights stored [in, out]; W1 rows zero-padded to IN_W=round_up(num_inputs,128)
# and the two heads packed + zero-padded to OUT_W=round_up(2A,128) at init time,
# so no per-call packing/padding of weights is needed.
# ----------------------------------------------------------------------------
def xavier_uniform(key, fan_in, fan_out):
    limit = (6.0 / (fan_in + fan_out)) ** 0.5
    return jax.random.uniform(
        key, (fan_in, fan_out), dtype=jnp.float32, minval=-limit, maxval=limit
    )


def init_gaussian_policy_params(key, num_inputs, num_actions, hidden_dim):
    H, A = hidden_dim, num_actions
    IN_W = _round_up(num_inputs, 128)
    OUT_W = _round_up(2 * A, 128)
    keys = jax.random.split(key, 4)

    w1 = xavier_uniform(keys[0], num_inputs, H)
    w1 = jnp.pad(w1, ((0, IN_W - num_inputs), (0, 0)))          # zero rows for padded K

    w_mean = xavier_uniform(keys[2], H, A)
    w_log_std = xavier_uniform(keys[3], H, A)
    w_head = jnp.concatenate([w_mean, w_log_std], axis=1)       # [H, 2A]
    w_head = jnp.pad(w_head, ((0, 0), (0, OUT_W - 2 * A)))      # zero pad lanes

    return {
        "w1": w1,                                               # [IN_W, H]
        "b1": jnp.zeros((1, H), jnp.float32),
        "w2": xavier_uniform(keys[1], H, H),                    # [H, H]
        "b2": jnp.zeros((1, H), jnp.float32),
        "w_head": w_head,                                       # [H, OUT_W]
        "b_head": jnp.zeros((1, OUT_W), jnp.float32),
    }


# ----------------------------------------------------------------------------
# Pure-JAX reference (mathematically identical to the torch forward(); the
# zero-padded K rows / head lanes contribute nothing).
# ----------------------------------------------------------------------------
def gaussian_policy_ref(state, p, num_actions):
    A = num_actions
    IN_W = p["w1"].shape[0]
    x = jnp.pad(state, ((0, 0), (0, IN_W - state.shape[1])))
    h = jax.nn.relu(x @ p["w1"] + p["b1"])
    h = jax.nn.relu(h @ p["w2"] + p["b2"])
    out = h @ p["w_head"] + p["b_head"]
    mean = out[:, :A]
    log_std = jnp.clip(out[:, A:2 * A], LOG_SIG_MIN, LOG_SIG_MAX)
    return mean, log_std


if __name__ == "__main__":
    # TODO(synk): GaussianPolicy.sample() (Normal rsample / tanh squash / log_prob)
    # is outside forward() and intentionally not implemented here.
    num_inputs, num_actions, hidden_dim = 8, 4, 32
    batch = 2

    key = jax.random.PRNGKey(0)
    k_params, k_state = jax.random.split(key, 2)

    params = init_gaussian_policy_params(k_params, num_inputs, num_actions, hidden_dim)
    state = jax.random.normal(k_state, (batch, num_inputs), dtype=jnp.float32)

    r_mean, r_log_std = gaussian_policy_ref(state, params, num_actions)

    # f32 compute path: tight check vs. reference.
    mean, log_std = gaussian_policy_forward(state, params, num_actions)
    mean = jax.block_until_ready(mean)
    log_std = jax.block_until_ready(log_std)

    assert mean.shape == (batch, num_actions)
    assert log_std.shape == (batch, num_actions)
    assert jnp.allclose(mean, r_mean, atol=1e-5, rtol=1e-5)
    assert jnp.allclose(log_std, r_log_std, atol=1e-5, rtol=1e-5)
    assert bool(jnp.all(log_std <= LOG_SIG_MAX)) and bool(jnp.all(log_std >= LOG_SIG_MIN))

    # bf16 compute path (native MXU dtype on v6e/v7x): looser tolerance.
    mean_bf, log_std_bf = gaussian_policy_forward(
        state, params, num_actions, compute_dtype=jnp.bfloat16)
    mean_bf = jax.block_until_ready(mean_bf)
    log_std_bf = jax.block_until_ready(log_std_bf)
    assert jnp.allclose(mean_bf, r_mean, atol=5e-2, rtol=5e-2)
    assert jnp.allclose(log_std_bf, r_log_std, atol=5e-2, rtol=5e-2)
    assert bool(jnp.all(log_std_bf <= LOG_SIG_MAX)) and bool(jnp.all(log_std_bf >= LOG_SIG_MIN))

    print("KERNEL_OK")
</pallas_src>

<mosaic_0001>
module attributes {stable_mosaic.version = 11 : i64} {
  func.func @gaussian_policy_kernel(%arg0: i32, %arg1: memref<8x128xf32, #tpu.memory_space<vmem>>, %arg2: memref<128x32xf32, #tpu.memory_space<vmem>>, %arg3: memref<1x32xf32, #tpu.memory_space<vmem>>, %arg4: memref<32x32xf32, #tpu.memory_space<vmem>>, %arg5: memref<1x32xf32, #tpu.memory_space<vmem>>, %arg6: memref<32x128xf32, #tpu.memory_space<vmem>>, %arg7: memref<1x128xf32, #tpu.memory_space<vmem>>, %arg8: memref<8x128xf32, #tpu.memory_space<vmem>>) attributes {dimension_semantics = [#tpu.dimension_semantics<parallel>], iteration_bounds = array<i64: 1>, scalar_prefetch = 0 : i64, scratch_operands = 0 : i64, tpu.core_type = #tpu.core_type<tc>, window_params = [{transform_indices = @transform_0, window_bounds = array<i64: 8, 128>}, {pipeline_mode = #tpu.pipeline_mode<synchronous>, transform_indices = @transform_1, window_bounds = array<i64: 128, 32>}, {pipeline_mode = #tpu.pipeline_mode<synchronous>, transform_indices = @transform_2, window_bounds = array<i64: 1, 32>}, {pipeline_mode = #tpu.pipeline_mode<synchronous>, transform_indices = @transform_3, window_bounds = array<i64: 32, 32>}, {pipeline_mode = #tpu.pipeline_mode<synchronous>, transform_indices = @transform_4, window_bounds = array<i64: 1, 32>}, {pipeline_mode = #tpu.pipeline_mode<synchronous>, transform_indices = @transform_5, window_bounds = array<i64: 32, 128>}, {pipeline_mode = #tpu.pipeline_mode<synchronous>, transform_indices = @transform_6, window_bounds = array<i64: 1, 128>}, {transform_indices = @transform_7, window_bounds = array<i64: 8, 128>}]} {
    %c0 = arith.constant 0 : index
    %c0_0 = arith.constant 0 : index
    %0 = vector.load %arg1[%c0, %c0_0] : memref<8x128xf32, #tpu.memory_space<vmem>>, vector<8x128xf32>
    %c0_1 = arith.constant 0 : index
    %c0_2 = arith.constant 0 : index
    %1 = vector.load %arg2[%c0_1, %c0_2] : memref<128x32xf32, #tpu.memory_space<vmem>>, vector<128x32xf32>
    %cst = arith.constant dense<0.000000e+00> : vector<8x32xf32>
    %2 = tpu.matmul %0, %1, %cst {dimension_numbers = #tpu.dot_dimension_numbers<[1], [0], [0], [1], [0, 0, 1, 1], [], []>} : vector<8x128xf32>, vector<128x32xf32>, vector<8x32xf32> -> vector<8x32xf32>
    %c0_3 = arith.constant 0 : index
    %c0_4 = arith.constant 0 : index
    %3 = vector.load %arg3[%c0_3, %c0_4] : memref<1x32xf32, #tpu.memory_space<vmem>>, vector<1x32xf32>
    %4 = vector.broadcast %3 : vector<1x32xf32> to vector<8x32xf32>
    %5 = arith.addf %2, %4 : vector<8x32xf32>
    %cst_5 = arith.constant 0.000000e+00 : f32
    %6 = vector.broadcast %cst_5 : f32 to vector<8x32xf32>
    %7 = arith.maximumf %5, %6 : vector<8x32xf32>
    %c0_6 = arith.constant 0 : index
    %c0_7 = arith.constant 0 : index
    %8 = vector.load %arg4[%c0_6, %c0_7] : memref<32x32xf32, #tpu.memory_space<vmem>>, vector<32x32xf32>
    %cst_8 = arith.constant dense<0.000000e+00> : vector<8x32xf32>
    %9 = tpu.matmul %7, %8, %cst_8 {dimension_numbers = #tpu.dot_dimension_numbers<[1], [0], [0], [1], [0, 0, 1, 1], [], []>} : vector<8x32xf32>, vector<32x32xf32>, vector<8x32xf32> -> vector<8x32xf32>
    %c0_9 = arith.constant 0 : index
    %c0_10 = arith.constant 0 : index
    %10 = vector.load %arg5[%c0_9, %c0_10] : memref<1x32xf32, #tpu.memory_space<vmem>>, vector<1x32xf32>
    %11 = vector.broadcast %10 : vector<1x32xf32> to vector<8x32xf32>
    %12 = arith.addf %9, %11 : vector<8x32xf32>
    %cst_11 = arith.constant 0.000000e+00 : f32
    %13 = vector.broadcast %cst_11 : f32 to vector<8x32xf32>
    %14 = arith.maximumf %12, %13 : vector<8x32xf32>
    %c0_12 = arith.constant 0 : index
    %c0_13 = arith.constant 0 : index
    %15 = vector.load %arg6[%c0_12, %c0_13] : memref<32x128xf32, #tpu.memory_space<vmem>>, vector<32x128xf32>
    %cst_14 = arith.constant dense<0.000000e+00> : vector<8x128xf32>
    %16 = tpu.matmul %14, %15, %cst_14 {dimension_numbers = #tpu.dot_dimension_numbers<[1], [0], [0], [1], [0, 0, 1, 1], [], []>} : vector<8x32xf32>, vector<32x128xf32>, vector<8x128xf32> -> vector<8x128xf32>
    %c0_15 = arith.constant 0 : index
    %c0_16 = arith.constant 0 : index
    %17 = vector.load %arg7[%c0_15, %c0_16] : memref<1x128xf32, #tpu.memory_space<vmem>>, vector<1x128xf32>
    %18 = vector.broadcast %17 : vector<1x128xf32> to vector<8x128xf32>
    %19 = arith.addf %16, %18 : vector<8x128xf32>
    %20 = tpu.iota {dimensions = array<i32: 1>} : vector<8x128xi32>
    %cst_17 = arith.constant -2.000000e+01 : f32
    %cst_18 = arith.constant 2.000000e+00 : f32
    %21 = vector.broadcast %cst_17 : f32 to vector<8x128xf32>
    %22 = arith.maximumf %21, %19 : vector<8x128xf32>
    %23 = vector.broadcast %cst_18 : f32 to vector<8x128xf32>
    %24 = arith.minimumf %23, %22 : vector<8x128xf32>
    %c4_i32 = arith.constant 4 : i32
    %25 = vector.broadcast %c4_i32 : i32 to vector<8x128xi32>
    %26 = arith.cmpi sge, %20, %25 : vector<8x128xi32>
    %27 = arith.select %26, %24, %19 : vector<8x128xi1>, vector<8x128xf32>
    %c0_19 = arith.constant 0 : index
    %c0_20 = arith.constant 0 : index
    %28 = vector.load %arg8[%c0_19, %c0_20] : memref<8x128xf32, #tpu.memory_space<vmem>>, vector<8x128xf32>
    tpu.vector_store %arg8[%c0_19, %c0_20], %27 {strides = array<i32>} : memref<8x128xf32, #tpu.memory_space<vmem>>, vector<8x128xf32>,
    return
  }
  func.func @transform_0(%arg0: i32) -> (i32, i32) {
    %c0_i32 = arith.constant 0 : i32
    %c0_i32_0 = arith.constant 0 : i32
    return %arg0, %c0_i32 : i32, i32
  }
  func.func @transform_1(%arg0: i32) -> (i32, i32) {
    %c0_i32 = arith.constant 0 : i32
    %c0_i32_0 = arith.constant 0 : i32
    %c0_i32_1 = arith.constant 0 : i32
    return %c0_i32, %c0_i32_0 : i32, i32
  }
  func.func @transform_2(%arg0: i32) -> (i32, i32) {
    %c0_i32 = arith.constant 0 : i32
    %c0_i32_0 = arith.constant 0 : i32
    %c0_i32_1 = arith.constant 0 : i32
    return %c0_i32, %c0_i32_0 : i32, i32
  }
  func.func @transform_3(%arg0: i32) -> (i32, i32) {
    %c0_i32 = arith.constant 0 : i32
    %c0_i32_0 = arith.constant 0 : i32
    %c0_i32_1 = arith.constant 0 : i32
    return %c0_i32, %c0_i32_0 : i32, i32
  }
  func.func @transform_4(%arg0: i32) -> (i32, i32) {
    %c0_i32 = arith.constant 0 : i32
    %c0_i32_0 = arith.constant 0 : i32
    %c0_i32_1 = arith.constant 0 : i32
    return %c0_i32, %c0_i32_0 : i32, i32
  }
  func.func @transform_5(%arg0: i32) -> (i32, i32) {
    %c0_i32 = arith.constant 0 : i32
    %c0_i32_0 = arith.constant 0 : i32
    %c0_i32_1 = arith.constant 0 : i32
    return %c0_i32, %c0_i32_0 : i32, i32
  }
  func.func @transform_6(%arg0: i32) -> (i32, i32) {
    %c0_i32 = arith.constant 0 : i32
    %c0_i32_0 = arith.constant 0 : i32
    %c0_i32_1 = arith.constant 0 : i32
    return %c0_i32, %c0_i32_0 : i32, i32
  }
  func.func @transform_7(%arg0: i32) -> (i32, i32) {
    %c0_i32 = arith.constant 0 : i32
    %c0_i32_0 = arith.constant 0 : i32
    return %arg0, %c0_i32 : i32, i32
  }
}

</mosaic_0001>

<bundles_post_ra>
// kernel: tpu_custom_call.1
= control target key start
LH: loop header
LB: loop body
LE: loop exit
PB: predicated region body
PF: predicated region fallthrough
CT: control target
= control target key end

     0   :  { %v466_v3 = vmov 0.0|0.0   ;;  %vm467_vm0 = vmmov 0   ;;  %v468_v6 = vmov 0.0   ;;  %s623_s0 = inlined_call_operand.vmem [shape: f32[8,128], index: 0, kind: input, shape index: {}]   ;;  %s624_s1 = inlined_call_operand.vmem [shape: f32[128,32], index: 1, kind: input, shape index: {}]   ;;  %s625_s2 = inlined_call_operand.vmem [shape: f32[1,32], index: 2, kind: input, shape index: {}]   ;;  %s626_s3 = inlined_call_operand.vmem [shape: f32[32,32], index: 3, kind: input, shape index: {}]   ;;  %s627_s4 = inlined_call_operand.vmem [shape: f32[1,32], index: 4, kind: input, shape index: {}]   ;;  %s628_s5 = inlined_call_operand.vmem [shape: f32[32,128], index: 5, kind: input, shape index: {}]   ;;  %s629_s6 = inlined_call_operand.vmem [shape: f32[1,128], index: 6, kind: input, shape index: {}]   ;;  %s630_s7 = inlined_call_operand.hbm [shape: f32[8,128], index: 7, kind: output, shape index: {}]  }
   0x1   :  { %v28_v0 = vld [vmem:[%s624_s1] sm:$0xff]  ;;  %v29_v1 = vld [vmem:[%s624_s1 + $0x8] sm:$0xff]  ;;  %v30_v2 = vld [vmem:[%s624_s1 + $0x10] sm:$0xff]  ;;  %402 = vmatprep.subr.bf16.mxu0 %v466_v3  ;;  %377 = vmatprep.mubr.msk.f32.mxu0 %vm467_vm0, %v468_v6 }
   0x2   :  { %v403_v4 = vpack.c.bf16 %v29_v1, %v28_v0  ;;  %v31_v5 = vld [vmem:[%s624_s1 + $0x18] sm:$0xff]  ;;  %426 = vmatprep.subr.bf16.mxu1 %v466_v3  ;;  %388 = vmatprep.mubr.msk.f32.mxu1 %vm467_vm0, %v468_v6  ;;  %v32_v8 = vld [vmem:[%s624_s1 + $0x20] sm:$0xff]  ;;  %v33_v9 = vld [vmem:[%s624_s1 + $0x28] sm:$0xff] }
   0x3   :  { %v406_v7 = vpack.c.bf16 %v31_v5, %v30_v2  ;;  %v122_v10 = vld [vmem:[%s626_s3] sm:$0xff]  ;;  %v123_v11 = vld [vmem:[%s626_s3 + $0x8] sm:$0xff] }
   0x4   :  { %404 = vmatpush3.bf16.msra.mxu0 %v403_v4 }
   0x5   :  { %405 = vmatprep.subr.bf16.mxu0 %v466_v3 }
   0x6   :  { %12 = vsyncpa [#allocation3], 0  ;;  %v409_v12 = vpack.c.bf16 %v33_v9, %v32_v8  ;;  %v427_v13 = vpack.c.bf16 %v123_v11, %v122_v10  ;;  %v34_v14 = vld [vmem:[%s624_s1 + $0x30] sm:$0xff]  ;;  %v35_v15 = vld [vmem:[%s624_s1 + $0x38] sm:$0xff]  ;;  %vm133_vm1 = vcmask 261120   ;;  %v292_v49 = vlaneseq }
   0x7   :  { %v412_v16 = vpack.c.bf16 %v35_v15, %v34_v14  ;;  %v36_v17 = vld [vmem:[%s624_s1 + $0x40] sm:$0xff]  ;;  %v37_v18 = vld [vmem:[%s624_s1 + $0x48] sm:$0xff]  ;;  %v38_v20 = vld [vmem:[%s624_s1 + $0x50] sm:$0xff] }
   0x8   :  { %407 = vmatpush3.bf16.msra.mxu0 %v406_v7  ;;  %428 = vmatpush3.bf16.msra.mxu1 %v427_v13  ;;  %v415_v19 = vpack.c.bf16 %v37_v18, %v36_v17  ;;  %v39_v21 = vld [vmem:[%s624_s1 + $0x58] sm:$0xff]  ;;  %v40_v23 = vld [vmem:[%s624_s1 + $0x60] sm:$0xff]  ;;  %v41_v24 = vld [vmem:[%s624_s1 + $0x68] sm:$0xff]  ;;  %v293_v52 = vand.u32 127, %v292_v49 }
   0x9   :  { %408 = vmatprep.subr.bf16.mxu0 %v466_v3  ;;  %429 = vmatprep.subr.bf16.mxu1 %v466_v3  ;;  %v418_v22 = vpack.c.bf16 %v39_v21, %v38_v20  ;;  %v421_v25 = vpack.c.bf16 %v41_v24, %v40_v23  ;;  %v42_v26 = vld [vmem:[%s624_s1 + $0x70] sm:$0xff]  ;;  %v43_v27 = vld [vmem:[%s624_s1 + $0x78] sm:$0xff]  ;;  %v27_v29 = vld [vmem:[%s623_s0] sm:$0xff] }
   0xa   :  { %v424_v28 = vpack.c.bf16 %v43_v27, %v42_v26  ;;  %v124_v30 = vld [vmem:[%s626_s3 + $0x10] sm:$0xff]  ;;  %v125_v31 = vld [vmem:[%s626_s3 + $0x18] sm:$0xff]  ;;  %v313_v33 = vld [vmem:[%s625_s2] ss:$0 sm:$0xff]  ;;  %vm296_vm2 = vcmp.ge.s32.totalorder %v293_v52, 4 }
   0xb   :  { %v430_v32 = vpack.c.bf16 %v125_v31, %v124_v30  ;;  %v208_v34 = vld [vmem:[%s628_s5] sm:$0xff]  ;;  %v209_v35 = vld [vmem:[%s628_s5 + $0x8] sm:$0xff]  ;;  %v210_v41 = vld [vmem:[%s628_s5 + $0x10] sm:$0xff] }
   0xc   :  { %410 = vmatpush3.bf16.msra.mxu0 %v409_v12  ;;  %v433_v39 = vpack.c.bf16 %v209_v35, %v208_v34  ;;  %v211_v42 = vld [vmem:[%s628_s5 + $0x18] sm:$0xff]  ;;  %v314_v44 = vld [vmem:[%s627_s4] ss:$0 sm:$0xff]  ;;  %s469_s5 = smov [#allocation2]  }
   0xd   :  { %411 = vmatprep.subr.bf16.mxu0 %v466_v3  ;;  %431 = vmatpush3.bf16.msra.mxu1 %v430_v32  ;;  %v436_v43 = vpack.c.bf16 %v211_v42, %v210_v41  ;;  %v316_v50 = vld [vmem:[%s629_s6] ss:$0 sm:$0xff]  ;;  %s305_s30 = sshll.u32 %s469_s5, 4  ;;  %s306_s30 = int_to_ptr.vmem [resolvable:$true] %s305_s30 }
   0xe   :  { %432 = vmatprep.subr.bf16.mxu1 %v466_v3  ;;  %s442_s4 = scalar_lea.vmem %s306_s30, 128  ;;  %p447_p1 = scmp.lt.s32.totalorder %s306_s30, %s306_s30 }
   0xf   :  { %p443_p0 = scmp.ne.s32.totalorder %s306_s30, %s442_s4  ;;  %p448_p2 = scmp.lt.s32.totalorder %s442_s4, %s442_s4 }
  0x10   :  { %413 = vmatpush3.bf16.msra.mxu0 %v412_v16 }
  0x11   :  { %414 = vmatprep.subr.bf16.mxu0 %v466_v3  ;;  %p449_p3 = por %p448_p2, %p447_p1 }
  0x13   :  { %p450_p4 = pnand %p449_p3, %p443_p0 }
  0x14   :  { %416 = vmatpush3.bf16.msra.mxu0 %v415_v19 }
  0x15   :  { %417 = vmatprep.subr.bf16.mxu0 %v466_v3 }
  0x18   :  { %419 = vmatpush3.bf16.msra.mxu0 %v418_v22 }
  0x19   :  { %420 = vmatprep.subr.bf16.mxu0 %v466_v3 }
  0x1c   :  { %422 = vmatpush3.bf16.msra.mxu0 %v421_v25 }
  0x1d   :  { %423 = vmatprep.subr.bf16.mxu0 %v466_v3 }
  0x20   :  { %425 = vmatpush3.bf16.msra.mxu0 %v424_v28 }
  0x23   :  { %378 = vmatmul.mubr.f32.vlgmr.msra.gmra.mrb[0].mxu0 %v27_v29 }
  0xf6   :  { %v117_v36 = vpop.f32.mrb[0].mxu0 }
  0xf7   :  { %v118_v37 = vadd.f32 %v313_v33, %v117_v36  ;;  %v379_v38 = vpop.f32.mrb[1].mxu0 }
  0xf9   :  { %v121_v40 = vmax.f32 %v118_v37, 0.0 }
  0xfb   :  { %389 = vmatmul.mubr.msk.f32.vlgmr.msra.gmra.mrb[0].mxu1 %vm133_vm1, %v121_v40 }
  0xfc   :  { %434 = vmatpush3.bf16.msra.mxu1 %v433_v39  ;;  %399 = vmatprep.mubr.msk.f32.mxu1 %vm467_vm0, %v468_v6 }
  0xfd   :  { %435 = vmatprep.subr.bf16.mxu1 %v466_v3 }
 0x100   :  { %437 = vmatpush3.bf16.msra.mxu1 %v436_v43 }
 0x1ce   :  { %v203_v45 = vpop.f32.mrb[0].mxu1 }
 0x1cf   :  { %v204_v46 = vadd.f32 %v314_v44, %v203_v45  ;;  %v390_v47 = vpop.f32.mrb[1].mxu1 }
 0x1d1   :  { %v207_v48 = vmax.f32 %v204_v46, 0.0 }
 0x1d3   :  { %400 = vmatmul.mubr.msk.f32.vlgmr.msra.gmra.mrb[2].mxu1 %vm133_vm1, %v207_v48 }
 0x2a6   :  { %v288_v51 = vpop.f32.mrb[2].mxu1 }
 0x2a7   :  { %v289_v53 = vadd.f32 %v316_v50, %v288_v51  ;;  %v401_v54 = vpop.f32.mrb[3].mxu1 }
 0x2a9   :  { %v294_v55 = vmax.f32 %v289_v53, -20.0 }
 0x2ab   :  { %v295_v56 = vmin.f32 %v294_v55, 2.0 }
 0x2ad   :  { %v297_v57 = vsel %vm296_vm2, %v295_v56, %v289_v53 }
 0x2ae   :  { %298 = vst [vmem:[#allocation2] sm:$0xff] %v297_v57 }
 0x2af   :  { %453 = shalt.err (!%p450_p4)
}
 0x2b0   :  { %s454_s9 = scalar_lea.hbm %s630_s7, 128 }
 0x2b1   :  { %p455_p5 = scmp.ne.s32.totalorder %s630_s7, %s454_s9  ;;  %p458_p6 = scmp.lt.u32.totalorder %s454_s9, %s630_s7 }
 0x2b3   :  { %p460_p7 = pnand %p458_p6, %p455_p5 }
 0x2b5   :  { %463 = shalt.err (!%p460_p7)
}
 0x2b6   :  { %308 = dma.vmem_to_hbm [thread:$0]  %s306_s30, 128, %s630_s7, [#allocation3]  }
 0x2b7   :  { %464 = dma.done.wait [#allocation3], 128  }
 0x2b8   :  { %465 = vsyncadd [#allocation3], 4294967168 }
 0x2b9   :  { %312 = vsyncpa [#allocation3], 1 }

</bundles_post_ra>
